<compile_context>
chip_gen: v6e
topology: v6e:2x2x1
jax: 0.10.0
libtpu: 0.0.40
codegen_flags: <defaults>
</compile_context>

<pallas_src>
import functools

import jax
import jax.numpy as jnp
from jax.experimental import pallas as pl
from jax.experimental.pallas import tpu as pltpu


_TK_CAP = 2048  # lanes; tile-size returns flatten past ~1024-2048 lanes


def _round_up(x, m):
    return ((x + m - 1) // m) * m


def _device_kind():
    try:
        return jax.devices()[0].device_kind.lower()
    except Exception:
        return ""


def _num_tensorcores():
    # v7x has 2 TensorCores per chip; v5e/v6e have 1.
    kind = _device_kind()
    return 2 if ("v7" in kind or "tpu7" in kind) else 1


def _vmem_budgets():
    """(vmem_limit_bytes, input_tile_budget_bytes), generation-aware."""
    kind = _device_kind()
    if "v7" in kind or "tpu7" in kind:
        return 40 * 1024 * 1024, 16 * 1024 * 1024   # 64 MiB physical VMEM
    return 96 * 1024 * 1024, 32 * 1024 * 1024       # 128 MiB (v5e / v6e)


def _choose_tm(c_pad):
    # Output-row tile.  Splitting C only pays when a second TensorCore exists
    # (v7x); on single-TC chips it just re-streams F nrb times (pure BW loss).
    if _num_tensorcores() >= 2 and c_pad >= 512 and c_pad % 256 == 0:
        return 256
    return c_pad


def _choose_tk(rows_per_col_tile, hw, bytes_per_elem, input_budget_bytes):
    """Pick (tk, nk, hw_pad).

    128-aligned reduction tile, nk >= 2 whenever HW has at least two 128-lane
    blocks (so DMA(k+1) overlaps compute(k)), tk capped at _TK_CAP lanes, and
    double-buffered (rows, tk) input tiles kept within the VMEM budget.
    Column padding is bounded at <= (nk-1)*128 zero columns.
    """
    hw128 = _round_up(hw, 128)
    per_col_bytes = 2 * rows_per_col_tile * bytes_per_elem   # x2: double buffer
    tk_budget = max(128, (input_budget_bytes // per_col_bytes) // 128 * 128)
    tk_max = min(tk_budget, _TK_CAP, hw128)
    if hw128 >= 256:
        # Never let one tile swallow all of HW: keep at least 2 grid steps.
        tk_max = min(tk_max, _round_up(pl.cdiv(hw128, 2), 128))
    nk = pl.cdiv(hw128, tk_max)
    tk = _round_up(pl.cdiv(hw128, nk), 128)
    return tk, nk, nk * tk


def _prep_features(x, use_bf16):
    """(1, C, H, W) -> (C_pad, HW) features matching torch .view(c, h*w)."""
    b, c, h, w = x.shape
    assert b == 1, "torch gram_matrix's view(c, h*w) implies batch == 1"
    hw = h * w
    f = x.reshape(c, hw)
    if use_bf16:
        f = f.astype(jnp.bfloat16)   # halves HBM traffic; accumulation is f32
    # Lane-dense output stores: pad channel rows to >= 128 so the (.., C_pad)
    # gram stores are unmasked vst; zero rows add exactly 0 to F @ F^T.
    c_pad = c if c >= 128 else 128
    if c_pad != c:
        f = jnp.pad(f, ((0, c_pad - c), (0, 0)))
    return f, c, hw, c_pad


# ---------------------------------------------------------------------------
# Kernel 1: Gram matrix  G = (F @ F^T) * scale, reduction over HW in tiles.
# (Used once, for the target gram in StyleLoss.__init__.)  The output block is
# constant across the (only) grid axis, so it stays resident in VMEM and is
# used directly as the accumulator -- no scratch buffer.
# ---------------------------------------------------------------------------
def _gram_kernel(f_ref, g_ref, *, scale):
    k = pl.program_id(0)

    @pl.when(k == 0)
    def _():
        g_ref[...] = jnp.zeros_like(g_ref)

    f = f_ref[...]
    g_ref[...] += jax.lax.dot_general(
        f, f,
        dimension_numbers=(((1,), (1,)), ((), ())),   # F @ F^T, no transpose op
        preferred_element_type=jnp.float32)

    @pl.when(k == pl.num_programs(0) - 1)
    def _():
        g_ref[...] = g_ref[...] * scale


def gram_matrix(x, *, use_bf16=True):
    """x: (1, C, H, W) -> (C, C) gram matrix, matching torch gram_matrix."""
    f, c, hw, c_pad = _prep_features(x, use_bf16)
    bpe = jnp.dtype(f.dtype).itemsize
    vmem_limit, input_budget = _vmem_budgets()
    tk, nk, hw_pad = _choose_tk(c_pad, hw, bpe, input_budget)
    if hw_pad != f.shape[1]:
        f = jnp.pad(f, ((0, 0), (0, hw_pad - f.shape[1])))   # zero cols add 0
    scale = 1.0 / float(c * hw)                               # original H*W

    cost = pl.CostEstimate(
        flops=2 * c_pad * c_pad * hw_pad,
        transcendentals=0,
        bytes_accessed=c_pad * hw_pad * bpe + c_pad * c_pad * 4)

    g = pl.pallas_call(
        functools.partial(_gram_kernel, scale=scale),
        out_shape=jax.ShapeDtypeStruct((c_pad, c_pad), jnp.float32),
        grid_spec=pltpu.PrefetchScalarGridSpec(
            num_scalar_prefetch=0,
            grid=(nk,),
            in_specs=[pl.BlockSpec((c_pad, tk), lambda k: (0, k))],
            out_specs=pl.BlockSpec((c_pad, c_pad), lambda k: (0, 0)),
        ),
        compiler_params=pltpu.CompilerParams(
            dimension_semantics=("arbitrary",),
            vmem_limit_bytes=vmem_limit),
        cost_estimate=cost,
    )(f)
    return g[:c, :c]


# ---------------------------------------------------------------------------
# Kernel 2 (fused forward): per-row-block gram accumulation directly into the
# resident output block; epilogue rewrites it in place as (G*scale - target)^2.
# The row block is sliced in-kernel from the single streamed (C_pad, tk) F
# tile, so F is never streamed twice for the same (i, k) step.
# ---------------------------------------------------------------------------
def _gram_sqdiff_kernel(f_ref, t_ref, d_ref, *, tm, scale):
    i = pl.program_id(0)
    k = pl.program_id(1)

    @pl.when(k == 0)
    def _():
        d_ref[...] = jnp.zeros_like(d_ref)

    f_full = f_ref[...]
    if tm == f_ref.shape[0]:
        f_rows = f_full                                   # single row block
    else:
        # Row block i of F, sliced from the one streamed tile (no 2nd input).
        f_rows = f_ref[pl.ds(pl.multiple_of(i * tm, tm), tm), :]

    d_ref[...] += jax.lax.dot_general(
        f_rows, f_full,
        dimension_numbers=(((1,), (1,)), ((), ())),       # F_rows @ F^T
        preferred_element_type=jnp.float32)

    @pl.when(k == pl.num_programs(1) - 1)
    def _():
        diff = d_ref[...] * scale - t_ref[...]
        d_ref[...] = diff * diff


def style_mse_loss(x, target, *, use_bf16=True):
    """mean((gram_matrix(x) - target)^2); gram + squared diff fused in Pallas."""
    f, c, hw, c_pad = _prep_features(x, use_bf16)
    bpe = jnp.dtype(f.dtype).itemsize
    vmem_limit, input_budget = _vmem_budgets()
    tm = _choose_tm(c_pad)
    nrb = c_pad // tm
    tk, nk, hw_pad = _choose_tk(c_pad, hw, bpe, input_budget)
    if hw_pad != f.shape[1]:
        f = jnp.pad(f, ((0, 0), (0, hw_pad - f.shape[1])))
    tgt = target.astype(jnp.float32)
    if c_pad != c:
        tgt = jnp.pad(tgt, ((0, c_pad - c), (0, c_pad - c)))  # zero padding
    scale = 1.0 / float(c * hw)

    # TODO(synk): when the v7x row split is active, exploit gram symmetry
    # (compute only diagonal + lower-triangular column blocks and weight
    # off-diagonal sq-diff blocks by 2 in the final mean).

    cost = pl.CostEstimate(
        flops=2 * c_pad * c_pad * hw_pad,
        transcendentals=0,
        bytes_accessed=nrb * c_pad * hw_pad * bpe + 2 * c_pad * c_pad * 4)

    sq_diff = pl.pallas_call(
        functools.partial(_gram_sqdiff_kernel, tm=tm, scale=scale),
        out_shape=jax.ShapeDtypeStruct((c_pad, c_pad), jnp.float32),
        grid_spec=pltpu.PrefetchScalarGridSpec(
            num_scalar_prefetch=0,
            grid=(nrb, nk),
            in_specs=[pl.BlockSpec((c_pad, tk), lambda i, k: (0, k)),
                      pl.BlockSpec((tm, c_pad), lambda i, k: (i, 0))],
            out_specs=pl.BlockSpec((tm, c_pad), lambda i, k: (i, 0)),
        ),
        compiler_params=pltpu.CompilerParams(
            dimension_semantics=("parallel", "arbitrary"),
            vmem_limit_bytes=vmem_limit),
        cost_estimate=cost,
    )(f, tgt)

    # Padded rows/cols contribute exactly 0; torch mse_loss averages over the
    # original (C, C) gram, so divide by C*C (trivial reduction left to XLA).
    return jnp.sum(sq_diff) / jnp.float32(c * c)


# ---------------------------------------------------------------------------
# StyleLoss module equivalent.
# ---------------------------------------------------------------------------
class StyleLoss:
    def __init__(self, target_feature, *, use_bf16=True):
        self.use_bf16 = use_bf16
        # .detach() in torch -> stop_gradient here (no-op for inference).
        self.target = jax.lax.stop_gradient(
            gram_matrix(target_feature, use_bf16=use_bf16))
        self.loss = jnp.float32(0.0)

    def forward(self, x):
        # G = gram(x); loss = mse(G, target); return x.  Gram + squared diff
        # are fused into a single Pallas kernel launch.
        self.loss = style_mse_loss(x, self.target, use_bf16=self.use_bf16)
        return x


if __name__ == "__main__":
    key = jax.random.PRNGKey(0)
    k1, k2 = jax.random.split(key)

    # batch must be 1 (torch's view(c, h*w) requires it); channels=8, 16x16.
    B, C, H, W = 1, 8, 16, 16
    target_feature = jax.random.normal(k1, (B, C, H, W), dtype=jnp.float32)
    x = jax.random.normal(k2, (B, C, H, W), dtype=jnp.float32)

    # Pure-JAX reference.
    def gram_ref(t):
        b, c, h, w = t.shape
        f = t.reshape(c, h * w)
        return (f @ f.T) / (c * h * w)

    loss_ref = jnp.mean((gram_ref(x) - gram_ref(target_feature)) ** 2)

    # f32 streaming path: tight agreement with the reference.
    m32 = StyleLoss(target_feature, use_bf16=False)
    out32 = jax.block_until_ready(m32.forward(x))
    loss32 = jax.block_until_ready(m32.loss)
    assert out32.shape == x.shape and jnp.allclose(out32, x)
    assert jnp.allclose(loss32, loss_ref, rtol=1e-5, atol=1e-6), (loss32, loss_ref)

    # Default path (bf16 feature streaming, f32 MXU accumulation): ~1e-3 rel
    # error on gram entries, so the loss check uses a relaxed tolerance.
    module = StyleLoss(target_feature)
    out = jax.block_until_ready(module.forward(x))
    loss = jax.block_until_ready(module.loss)
    assert out.shape == x.shape and jnp.allclose(out, x)
    assert jnp.allclose(loss, loss_ref, rtol=5e-2, atol=1e-6), (loss, loss_ref)

    print("KERNEL_OK")
</pallas_src>

<mosaic_0001>
module attributes {stable_mosaic.version = 11 : i64} {
  func.func @_gram_kernel(%arg0: i32, %arg1: memref<128x128xf32, #tpu.memory_space<vmem>>, %arg2: memref<128x128xf32, #tpu.memory_space<vmem>>) attributes {dimension_semantics = [#tpu.dimension_semantics<arbitrary>], iteration_bounds = array<i64: 2>, scalar_prefetch = 0 : i64, scratch_operands = 0 : i64, tpu.core_type = #tpu.core_type<tc>, window_params = [{transform_indices = @transform_0, window_bounds = array<i64: 128, 128>}, {pipeline_mode = #tpu.pipeline_mode<synchronous>, transform_indices = @transform_1, window_bounds = array<i64: 128, 128>}]} {
    %c0_i32 = arith.constant 0 : i32
    %0 = arith.cmpi eq, %arg0, %c0_i32 : i32
    %1 = arith.extui %0 : i1 to i32
    %c0_i32_0 = arith.constant 0 : i32
    %2 = arith.cmpi ne, %1, %c0_i32_0 : i32
    scf.if %2 {
      %cst_7 = arith.constant 0.000000e+00 : f32
      %11 = vector.broadcast %cst_7 : f32 to vector<128x128xf32>
      %c0_8 = arith.constant 0 : index
      %c0_9 = arith.constant 0 : index
      %12 = vector.load %arg2[%c0_8, %c0_9] : memref<128x128xf32, #tpu.memory_space<vmem>>, vector<128x128xf32>
      tpu.vector_store %arg2[%c0_8, %c0_9], %11 {strides = array<i32>} : memref<128x128xf32, #tpu.memory_space<vmem>>, vector<128x128xf32>,
    } else {
    }
    %c0 = arith.constant 0 : index
    %c0_1 = arith.constant 0 : index
    %3 = vector.load %arg1[%c0, %c0_1] : memref<128x128xf32, #tpu.memory_space<vmem>>, vector<128x128xf32>
    %c0_2 = arith.constant 0 : index
    %c0_3 = arith.constant 0 : index
    %4 = vector.load %arg2[%c0_2, %c0_3] : memref<128x128xf32, #tpu.memory_space<vmem>>, vector<128x128xf32>
    %cst = arith.constant dense<0.000000e+00> : vector<128x128xf32>
    %5 = tpu.matmul %3, %3, %cst {dimension_numbers = #tpu.dot_dimension_numbers<[1], [1], [0], [0], [0, 0, 1, 0], [], []>} : vector<128x128xf32>, vector<128x128xf32>, vector<128x128xf32> -> vector<128x128xf32>
    %6 = arith.addf %4, %5 : vector<128x128xf32>
    %c0_4 = arith.constant 0 : index
    %c0_5 = arith.constant 0 : index
    %7 = vector.load %arg2[%c0_4, %c0_5] : memref<128x128xf32, #tpu.memory_space<vmem>>, vector<128x128xf32>
    tpu.vector_store %arg2[%c0_4, %c0_5], %6 {strides = array<i32>} : memref<128x128xf32, #tpu.memory_space<vmem>>, vector<128x128xf32>,
    %c1_i32 = arith.constant 1 : i32
    %8 = arith.cmpi eq, %arg0, %c1_i32 : i32
    %9 = arith.extui %8 : i1 to i32
    %c0_i32_6 = arith.constant 0 : i32
    %10 = arith.cmpi ne, %9, %c0_i32_6 : i32
    scf.if %10 {
      %c0_7 = arith.constant 0 : index
      %c0_8 = arith.constant 0 : index
      %11 = vector.load %arg2[%c0_7, %c0_8] : memref<128x128xf32, #tpu.memory_space<vmem>>, vector<128x128xf32>
      %cst_9 = arith.constant 4.8828125E-4 : f32
      %12 = vector.broadcast %cst_9 : f32 to vector<128x128xf32>
      %13 = arith.mulf %11, %12 : vector<128x128xf32>
      %c0_10 = arith.constant 0 : index
      %c0_11 = arith.constant 0 : index
      %14 = vector.load %arg2[%c0_10, %c0_11] : memref<128x128xf32, #tpu.memory_space<vmem>>, vector<128x128xf32>
      tpu.vector_store %arg2[%c0_10, %c0_11], %13 {strides = array<i32>} : memref<128x128xf32, #tpu.memory_space<vmem>>, vector<128x128xf32>,
    } else {
    }
    return
  }
  func.func @transform_0(%arg0: i32) -> (i32, i32) {
    %c0_i32 = arith.constant 0 : i32
    %c0_i32_0 = arith.constant 0 : i32
    return %c0_i32, %arg0 : i32, i32
  }
  func.func @transform_1(%arg0: i32) -> (i32, i32) {
    %c0_i32 = arith.constant 0 : i32
    %c0_i32_0 = arith.constant 0 : i32
    %c0_i32_1 = arith.constant 0 : i32
    return %c0_i32, %c0_i32_0 : i32, i32
  }
}

</mosaic_0001>

<bundles_post_ra>
// kernel: tpu_custom_call.1
= control target key start
LH: loop header
LB: loop body
LE: loop exit
PB: predicated region body
PF: predicated region fallthrough
CT: control target
= control target key end

     0   :  { %6 = vsyncpa [#allocation3], 0  ;;  %s925_s0 = inlined_call_operand.hbm [shape: f32[128,256], index: 0, kind: input, shape index: {}]   ;;  %s926_s1 = inlined_call_operand.hbm [shape: f32[128,128], index: 1, kind: output, shape index: {}]  }
   0x1   :  { %8 = vsyncpa [#allocation3 + $0x1], 0 }
   0x2   :  { %9 = vsyncpa [#allocation4], 0  ;;  %s757_s6 = smov 0   ;;  %s759_s7 = smov 0  }
   0x3   :  { %s761_s8 = smov 0   ;;  %s763_s9 = smov 0  }
   0x4 LB: > { %s776_s10 = sadd.s32 4294967295, %s737_s9   ;;  %s779_s11 = sadd.s32 1, %s737_s9   ;;  %s737_s9 = sphi %s763_s9, %s934_s9   ;;  %s733_s8 = sphi %s761_s8, %s933_s8   ;;  %s729_s7 = sphi %s759_s7, %s932_s7   ;;  %s725_s6 = sphi %s757_s6, %s931_s6  }
   0x5   : > { %s19_s12 = ssub.s32 %s737_s9, %s779_s11  ;;  %s22_s13 = sadd.s32 1, %s733_s8 }
   0x6   : > { %p20_p0 = scmp.eq.s32.totalorder %s19_s12, 0  ;;  %p29_p1 = scmp.ne.s32.totalorder %s733_s8, %s729_s7 }
   0x7   : > { %p30_p2 = scmp.eq.s32.totalorder %s737_s9, 0  ;;  %p35_p3 = scmp.ne.s32.totalorder %s729_s7, %s725_s6 }
   0x8   : > { %s789_s14 = scalar_select %p20_p0, %s733_s8, %s22_s13  }
   0x9   : > { %p31_p4 = por %p30_p2, %p29_p1  ;;  %p36_p5 = scmp.eq.s32.totalorder %s776_s10, 0 }
   0xa   : > { %p605_p6 = scmp.lt.s32.totalorder %s737_s9, 2  ;;  %s80_s16 = sand.u32 1, %s733_s8  }
   0xb   : > { %p793_p7 = por %p36_p5, %p35_p3  ;;  %s465_s17 = sshll.u32 %s80_s16, 7 }
   0xc   : > { %s466_s18 = sshll.u32 %s737_s9, 7  ;;  %s84_s22 = scalar_lea.vmem [#allocation2], %s465_s17 }
   0xd   : > { %s928_s15 = scalar_select %p793_p7, 1, 0 }
   0xe   : > { %s802_s21 = scalar_lea.hbm %s925_s0, %s466_s18  ;;  %s90_s23 = sshll.u32 %s84_s22, 4  ;;  %s804_s23 = int_to_ptr.vmem [resolvable:$true] %s90_s23 }
   0xf   : > { %p806_p8 = pnand %p605_p6, %p31_p4  ;;  %s810_s25 = scalar_lea.sflag [#allocation3], %s80_s16 }
  0x10   : > { %s647_s26 = scalar_lea.hbm %s802_s21, 2048  ;;  %s652_s29 = scalar_lea.hbm %s925_s0, 4096 }
  0x11   : > { %p648_p9 = scmp.ne.s32.totalorder %s802_s21, %s647_s26  ;;  %p649_p10 = pneg %p806_p8 }
  0x12   : > { %p653_p13 = scmp.lt.s32.totalorder %s802_s21, %s925_s0  ;;  %p654_p0 = scmp.lt.s32.totalorder %s652_s29, %s647_s26 }
  0x13   : > { %p650_p11 = pnand %p649_p10, %p648_p9 }
  0x14   : > { %p655_p1 = por %p654_p0, %p653_p13 }
  0x15   : > { %p651_p12 = pneg %p650_p11 }
  0x17   : > { %p656_p2 = pnand %p655_p1, %p651_p12 }
  0x19   : > { %659 = shalt.err (!%p656_p2)
}
  0x1a   : > { %s660_s3 = scalar_lea.vmem %s804_s23, 2048  ;;  %s739_s4 = smov [#allocation2]  }
  0x1b   : > { %p661_p3 = scmp.ne.s32.totalorder %s804_s23, %s660_s3  ;;  %s665_s5 = sshll.u32 %s739_s4, 4  ;;  %s666_s5 = int_to_ptr.vmem [resolvable:$false] %s665_s5 }
  0x1c   : > { %s667_s6 = scalar_lea.vmem %s666_s5, 4096  ;;  %p668_p6 = scmp.lt.s32.totalorder %s804_s23, %s666_s5 }
  0x1d   : > { %p663_p4 = pnand %p661_p3, %p649_p10  ;;  %p669_p9 = scmp.lt.s32.totalorder %s667_s6, %s660_s3 }
  0x1f   : > { %p664_p5 = pneg %p663_p4  ;;  %p670_p11 = por %p669_p9, %p668_p6 }
  0x21   : > { %p671_p7 = pnand %p670_p11, %p664_p5 }
  0x23   : > { %674 = shalt.err (!%p671_p7)
}
  0x24   : > { %s740_s12 = smov 256   ;;  %s741_s13 = smov 128  }
  0x25   : > { %s742_s16 = smov 8   ;;  %p467_p10 = scmp.ge.s32.totalorder %s737_s9, 1 }
  0x26   : > { %604 = dma.hbm_to_vmem [thread:$0]  (!%p806_p8), %s802_s21, 2048, %s804_s23, %s810_s25, %s740_s12, %s741_s13, %s742_s16  }
  0x27   : > { %p98_p12 = scmp.lt.s32.totalorder %s737_s9, 3 }
  0x29   : > { %p99_p13 = pnand %p467_p10, %p98_p12 }
  0x2a   : > { %s104_s17 = sand.u32 (!%p99_p13), 1, %s729_s7   ;;  %p930_p7 = scmp.ne.s32.totalorder (!%p99_p13), %s928_s15, 0 }
  0x2b   : > { %102 = sbr.rel (%p99_p13) target bundleno = 367 (0x16f), region = 24  ;;  %s468_s18 = sshll.u32 (!%p99_p13), %s104_s17, 7 }
  0x2c   : > { %s105_s19 = scalar_lea.sflag (!%p99_p13), [#allocation3], %s104_s17  ;;  %s834_s20 = scalar_lea.vmem (!%p99_p13), [#allocation2], %s468_s18 }
  0x30   : > { %716 = dma.done.wait (%p930_p7), %s105_s19, 2048  }
  0x31   : > { %718 = vsyncadd (%p930_p7), %s105_s19, 4294965248  ;;  %p469_p0 = scmp.ne.s32.totalorder %s776_s10, 0 }
  0x33   : > { %125 = sbr.rel (%p469_p0) target bundleno = 65 (0x41), region = 32 }
  0x38   : > { %v743_v0 = vmov 0.0  }
  0x39   : > { %126 = vst [vmem:[#allocation5] sm:$0xff] %v743_v0  ;;  %127 = vst [vmem:[#allocation5 + $0x8] sm:$0xff] %v743_v0 }
  0x3a   : > { %128 = vst [vmem:[#allocation5 + $0x10] sm:$0xff] %v743_v0  ;;  %129 = vst [vmem:[#allocation5 + $0x18] sm:$0xff] %v743_v0 }
  0x3b   : > { %130 = vst [vmem:[#allocation5 + $0x20] sm:$0xff] %v743_v0  ;;  %131 = vst [vmem:[#allocation5 + $0x28] sm:$0xff] %v743_v0 }
  0x3c   : > { %132 = vst [vmem:[#allocation5 + $0x30] sm:$0xff] %v743_v0  ;;  %133 = vst [vmem:[#allocation5 + $0x38] sm:$0xff] %v743_v0 }
  0x3d   : > { %134 = vst [vmem:[#allocation5 + $0x40] sm:$0xff] %v743_v0  ;;  %135 = vst [vmem:[#allocation5 + $0x48] sm:$0xff] %v743_v0 }
  0x3e   : > { %136 = vst [vmem:[#allocation5 + $0x50] sm:$0xff] %v743_v0  ;;  %137 = vst [vmem:[#allocation5 + $0x58] sm:$0xff] %v743_v0 }
  0x3f   : > { %138 = vst [vmem:[#allocation5 + $0x60] sm:$0xff] %v743_v0  ;;  %139 = vst [vmem:[#allocation5 + $0x68] sm:$0xff] %v743_v0 }
  0x40   : > { %140 = vst [vmem:[#allocation5 + $0x70] sm:$0xff] %v743_v0  ;;  %141 = vst [vmem:[#allocation5 + $0x78] sm:$0xff] %v743_v0 }
  0x41 PF: > { %v842_v1 = vld [vmem:[%s834_s20 + $0x78] sm:$0xff]  ;;  %v845_v2 = vld [vmem:[%s834_s20 + $0x70] sm:$0xff]  ;;  %v150_v3 = vld [vmem:[%s834_s20 + $0x40] sm:$0xff]  ;;  %p470_p8 = scmp.ne.s32.totalorder %s776_s10, 1 }
  0x42   : > { %507 = vmatprep.subr.mxu0 %v842_v1  ;;  %563 = vmatprep.subr.mxu1 %v842_v1  ;;  %v855_v4 = vld [vmem:[%s834_s20 + $0x68] sm:$0xff]  ;;  %v862_v5 = vld [vmem:[%s834_s20] sm:$0xff]  ;;  %v873_v7 = vld [vmem:[%s834_s20 + $0x58] sm:$0xff] }
  0x43   : > { %508 = vmatpush3.xpose.msra.mxu0 %v842_v1  ;;  %579 = vmatpush3.xpose.msra.mxu1 %v842_v1  ;;  %v865_v6 = vld [vmem:[%s834_s20 + $0x60] sm:$0xff]  ;;  %v152_v8 = vld [vmem:[%s834_s20 + $0x50] sm:$0xff]  ;;  %v151_v9 = vld [vmem:[%s834_s20 + $0x48] sm:$0xff] }
  0x44   : > { %509 = vmatprep.subr.mxu0 %v845_v2  ;;  %564 = vmatprep.subr.mxu1 %v845_v2  ;;  %v149_v10 = vld [vmem:[%s834_s20 + $0x38] sm:$0xff]  ;;  %v148_v11 = vld [vmem:[%s834_s20 + $0x30] sm:$0xff]  ;;  %v147_v12 = vld [vmem:[%s834_s20 + $0x28] sm:$0xff] }
  0x45   : > { %551 = vmatprep.mubr.f32.mxu1 %v150_v3  ;;  %539 = vmatprep.mubr.f32.mxu0 %v862_v5  ;;  %v146_v13 = vld [vmem:[%s834_s20 + $0x20] sm:$0xff]  ;;  %v145_v14 = vld [vmem:[%s834_s20 + $0x18] sm:$0xff]  ;;  %v144_v15 = vld [vmem:[%s834_s20 + $0x10] sm:$0xff] }
  0x46   : > { %v143_v16 = vld [vmem:[%s834_s20 + $0x8] sm:$0xff]  ;;  %v158_v21 = vld [vmem:[#allocation5] sm:$0xff]  ;;  %v161_v27 = vld [vmem:[#allocation5 + $0x18] sm:$0xff] }
  0x47   : > { %510 = vmatpush3.xpose.msra.mxu0 %v845_v2  ;;  %580 = vmatpush3.xpose.msra.mxu1 %v845_v2  ;;  %v159_v17 = vld [vmem:[#allocation5 + $0x8] sm:$0xff]  ;;  %v166_v22 = vld [vmem:[#allocation5 + $0x40] sm:$0xff]  ;;  %v169_v28 = vld [vmem:[#allocation5 + $0x58] sm:$0xff] }
  0x48   : > { %511 = vmatprep.subr.mxu0 %v855_v4  ;;  %565 = vmatprep.subr.mxu1 %v855_v4  ;;  %v167_v18 = vld [vmem:[#allocation5 + $0x48] sm:$0xff]  ;;  %v160_v33 = vld [vmem:[#allocation5 + $0x10] sm:$0xff]  ;;  %v162_v45 = vld [vmem:[#allocation5 + $0x20] sm:$0xff] }
  0x49   : > { %v168_v34 = vld [vmem:[#allocation5 + $0x50] sm:$0xff]  ;;  %v163_v39 = vld [vmem:[#allocation5 + $0x28] sm:$0xff]  ;;  %v170_v46 = vld [vmem:[#allocation5 + $0x60] sm:$0xff] }
  0x4a   : > { %v171_v40 = vld [vmem:[#allocation5 + $0x68] sm:$0xff]  ;;  %v165_v51 = vld [vmem:[#allocation5 + $0x38] sm:$0xff]  ;;  %v164_v57 = vld [vmem:[#allocation5 + $0x30] sm:$0xff] }
  0x4b   : > { %512 = vmatpush3.xpose.msra.mxu0 %v855_v4  ;;  %581 = vmatpush3.xpose.msra.mxu1 %v855_v4  ;;  %v173_v52 = vld [vmem:[#allocation5 + $0x78] sm:$0xff]  ;;  %v172_v58 = vld [vmem:[#allocation5 + $0x70] sm:$0xff] }
  0x4c   : > { %513 = vmatprep.subr.mxu0 %v865_v6  ;;  %566 = vmatprep.subr.mxu1 %v865_v6 }
  0x4f   : > { %514 = vmatpush3.xpose.msra.mxu0 %v865_v6  ;;  %582 = vmatpush3.xpose.msra.mxu1 %v865_v6 }
  0x50   : > { %515 = vmatprep.subr.mxu0 %v873_v7  ;;  %567 = vmatprep.subr.mxu1 %v873_v7 }
  0x53   : > { %516 = vmatpush3.xpose.msra.mxu0 %v873_v7  ;;  %583 = vmatpush3.xpose.msra.mxu1 %v873_v7 }
  0x54   : > { %517 = vmatprep.subr.mxu0 %v152_v8  ;;  %568 = vmatprep.subr.mxu1 %v152_v8 }
  0x57   : > { %518 = vmatpush3.xpose.msra.mxu0 %v152_v8  ;;  %584 = vmatpush3.xpose.msra.mxu1 %v152_v8 }
  0x58   : > { %519 = vmatprep.subr.mxu0 %v151_v9  ;;  %569 = vmatprep.subr.mxu1 %v151_v9 }
  0x5b   : > { %520 = vmatpush3.xpose.msra.mxu0 %v151_v9  ;;  %585 = vmatpush3.xpose.msra.mxu1 %v151_v9 }
  0x5c   : > { %521 = vmatprep.subr.mxu0 %v150_v3  ;;  %570 = vmatprep.subr.mxu1 %v150_v3 }
  0x5f   : > { %522 = vmatpush3.xpose.msra.mxu0 %v150_v3  ;;  %586 = vmatpush3.xpose.msra.mxu1 %v150_v3 }
  0x60   : > { %523 = vmatprep.subr.mxu0 %v149_v10  ;;  %571 = vmatprep.subr.mxu1 %v149_v10 }
  0x63   : > { %524 = vmatpush3.xpose.msra.mxu0 %v149_v10  ;;  %587 = vmatpush3.xpose.msra.mxu1 %v149_v10 }
  0x64   : > { %525 = vmatprep.subr.mxu0 %v148_v11  ;;  %572 = vmatprep.subr.mxu1 %v148_v11 }
  0x67   : > { %526 = vmatpush3.xpose.msra.mxu0 %v148_v11  ;;  %588 = vmatpush3.xpose.msra.mxu1 %v148_v11 }
  0x68   : > { %527 = vmatprep.subr.mxu0 %v147_v12  ;;  %573 = vmatprep.subr.mxu1 %v147_v12 }
  0x6b   : > { %528 = vmatpush3.xpose.msra.mxu0 %v147_v12  ;;  %589 = vmatpush3.xpose.msra.mxu1 %v147_v12 }
  0x6c   : > { %529 = vmatprep.subr.mxu0 %v146_v13  ;;  %574 = vmatprep.subr.mxu1 %v146_v13 }
  0x6f   : > { %530 = vmatpush3.xpose.msra.mxu0 %v146_v13  ;;  %590 = vmatpush3.xpose.msra.mxu1 %v146_v13 }
  0x70   : > { %531 = vmatprep.subr.mxu0 %v145_v14  ;;  %575 = vmatprep.subr.mxu1 %v145_v14 }
  0x73   : > { %532 = vmatpush3.xpose.msra.mxu0 %v145_v14  ;;  %591 = vmatpush3.xpose.msra.mxu1 %v145_v14 }
  0x74   : > { %533 = vmatprep.subr.mxu0 %v144_v15  ;;  %576 = vmatprep.subr.mxu1 %v144_v15 }
  0x77   : > { %534 = vmatpush3.xpose.msra.mxu0 %v144_v15  ;;  %592 = vmatpush3.xpose.msra.mxu1 %v144_v15 }
  0x78   : > { %535 = vmatprep.subr.mxu0 %v143_v16  ;;  %577 = vmatprep.subr.mxu1 %v143_v16 }
  0x7b   : > { %536 = vmatpush3.xpose.msra.mxu0 %v143_v16  ;;  %593 = vmatpush3.xpose.msra.mxu1 %v143_v16 }
  0x7c   : > { %537 = vmatprep.subr.mxu0 %v862_v5  ;;  %578 = vmatprep.subr.mxu1 %v862_v5 }
  0x7f   : > { %538 = vmatpush3.xpose.msra.mxu0 %v862_v5  ;;  %594 = vmatpush3.xpose.msra.mxu1 %v862_v5 }
  0x82   : > { %540 = vmatmul.mubr.f32.vlgmr.msra.gmra.mxu0 %v143_v16  ;;  %552 = vmatmul.mubr.f32.vlgmr.msra.gmra.mxu1 %v151_v9 }
  0x83   : > { %542 = vmatprep.mubr.f32.mxu0 %v144_v15  ;;  %554 = vmatprep.mubr.f32.mxu1 %v152_v8 }
  0x86   : > { %543 = vmatmul.mubr.f32.gmra.mxu0 %v145_v14  ;;  %555 = vmatmul.mubr.f32.gmra.mxu1 %v873_v7 }
  0x87   : > { %545 = vmatprep.mubr.f32.mxu0 %v146_v13  ;;  %557 = vmatprep.mubr.f32.mxu1 %v865_v6 }
  0x8a   : > { %546 = vmatmul.mubr.f32.gmra.mxu0 %v147_v12  ;;  %558 = vmatmul.mubr.f32.gmra.mxu1 %v855_v4 }
  0x8b   : > { %548 = vmatprep.mubr.f32.mxu0 %v148_v11  ;;  %560 = vmatprep.mubr.f32.mxu1 %v845_v2 }
  0x8e   : > { %549 = vmatmul.mubr.f32.gmra.mxu0 %v149_v10  ;;  %561 = vmatmul.mubr.f32.gmra.mxu1 %v842_v1 }
 0x142   : > { %v541_v19 = vpop.f32.mrf.mxu0  ;;  %v553_v20 = vpop.f32.mrf.mxu1 }
 0x143   : > { %v320_v23 = vadd.f32 %v541_v19, %v159_v17  ;;  %v328_v24 = vadd.f32 %v553_v20, %v167_v18 }
 0x144   : > { %v240_v25 = vpop.f32.mrf.mxu0  ;;  %v280_v26 = vpop.f32.mrf.mxu1 }
 0x145   : > { %336 = vst [vmem:[#allocation5 + $0x8] sm:$0xff] %v320_v23  ;;  %344 = vst [vmem:[#allocation5 + $0x48] sm:$0xff] %v328_v24  ;;  %v319_v29 = vadd.f32 %v240_v25, %v158_v21  ;;  %v327_v30 = vadd.f32 %v280_v26, %v166_v22 }
 0x146   : > { %v544_v31 = vpop.f32.mrf.mxu0  ;;  %v556_v32 = vpop.f32.mrf.mxu1 }
 0x147   : > { %335 = vst [vmem:[#allocation5] sm:$0xff] %v319_v29  ;;  %343 = vst [vmem:[#allocation5 + $0x40] sm:$0xff] %v327_v30  ;;  %v322_v35 = vadd.f32 %v544_v31, %v161_v27  ;;  %v330_v36 = vadd.f32 %v556_v32, %v169_v28 }
 0x148   : > { %v250_v37 = vpop.f32.mrf.mxu0  ;;  %v290_v38 = vpop.f32.mrf.mxu1 }
 0x149   : > { %338 = vst [vmem:[#allocation5 + $0x18] sm:$0xff] %v322_v35  ;;  %346 = vst [vmem:[#allocation5 + $0x58] sm:$0xff] %v330_v36  ;;  %v321_v41 = vadd.f32 %v250_v37, %v160_v33  ;;  %v329_v42 = vadd.f32 %v290_v38, %v168_v34 }
 0x14a   : > { %v547_v43 = vpop.f32.mrf.mxu0  ;;  %v559_v44 = vpop.f32.mrf.mxu1 }
 0x14b   : > { %337 = vst [vmem:[#allocation5 + $0x10] sm:$0xff] %v321_v41  ;;  %345 = vst [vmem:[#allocation5 + $0x50] sm:$0xff] %v329_v42  ;;  %v324_v47 = vadd.f32 %v547_v43, %v163_v39  ;;  %v332_v48 = vadd.f32 %v559_v44, %v171_v40 }
 0x14c   : > { %v260_v49 = vpop.f32.mrf.mxu0  ;;  %v300_v50 = vpop.f32.mrf.mxu1 }
 0x14d   : > { %340 = vst [vmem:[#allocation5 + $0x28] sm:$0xff] %v324_v47  ;;  %348 = vst [vmem:[#allocation5 + $0x68] sm:$0xff] %v332_v48  ;;  %v323_v53 = vadd.f32 %v260_v49, %v162_v45  ;;  %v331_v54 = vadd.f32 %v300_v50, %v170_v46 }
 0x14e   : > { %v550_v55 = vpop.f32.mrf.mxu0  ;;  %v562_v56 = vpop.f32.mrf.mxu1 }
 0x14f   : > { %339 = vst [vmem:[#allocation5 + $0x20] sm:$0xff] %v323_v53  ;;  %347 = vst [vmem:[#allocation5 + $0x60] sm:$0xff] %v331_v54  ;;  %v326_v59 = vadd.f32 %v550_v55, %v165_v51  ;;  %v334_v60 = vadd.f32 %v562_v56, %v173_v52  ;;  %354 = sbr.rel (%p470_p8) target bundleno = 351 (0x15f), region = 36 }
 0x150   : > { %v270_v61 = vpop.f32.mrf.mxu0  ;;  %v310_v62 = vpop.f32.mrf.mxu1 }
 0x151   : > { %342 = vst [vmem:[#allocation5 + $0x38] sm:$0xff] %v326_v59  ;;  %350 = vst [vmem:[#allocation5 + $0x78] sm:$0xff] %v334_v60  ;;  %v325_v63 = vadd.f32 %v270_v61, %v164_v57  ;;  %v333_v0 = vadd.f32 %v310_v62, %v172_v58 }
 0x153   : > { %341 = vst [vmem:[#allocation5 + $0x30] sm:$0xff] %v325_v63  ;;  %349 = vst [vmem:[#allocation5 + $0x70] sm:$0xff] %v333_v0 }
 0x154   : > { %v355_v1 = vld [vmem:[#allocation5] sm:$0xff]  ;;  %v356_v2 = vld [vmem:[#allocation5 + $0x8] sm:$0xff]  ;;  %v357_v3 = vld [vmem:[#allocation5 + $0x10] sm:$0xff] }
 0x155   : > { %v371_v4 = vmul.f32 0.00048828125, %v355_v1  ;;  %v372_v5 = vmul.f32 0.00048828125, %v356_v2  ;;  %v373_v6 = vmul.f32 0.00048828125, %v357_v3  ;;  %v358_v7 = vld [vmem:[#allocation5 + $0x18] sm:$0xff]  ;;  %v360_v9 = vld [vmem:[#allocation5 + $0x28] sm:$0xff]  ;;  %v363_v15 = vld [vmem:[#allocation5 + $0x40] sm:$0xff] }
 0x156   : > { %v359_v8 = vld [vmem:[#allocation5 + $0x20] sm:$0xff]  ;;  %v374_v10 = vmul.f32 0.00048828125, %v358_v7  ;;  %v376_v12 = vmul.f32 0.00048828125, %v360_v9  ;;  %v379_v18 = vmul.f32 0.00048828125, %v363_v15  ;;  %v364_v19 = vld [vmem:[#allocation5 + $0x48] sm:$0xff]  ;;  %v365_v20 = vld [vmem:[#allocation5 + $0x50] sm:$0xff] }
 0x157   : > { %v375_v11 = vmul.f32 0.00048828125, %v359_v8  ;;  %387 = vst [vmem:[#allocation5] sm:$0xff] %v371_v4  ;;  %388 = vst [vmem:[#allocation5 + $0x8] sm:$0xff] %v372_v5  ;;  %v366_v21 = vld [vmem:[#allocation5 + $0x58] sm:$0xff]  ;;  %v380_v22 = vmul.f32 0.00048828125, %v364_v19  ;;  %v381_v23 = vmul.f32 0.00048828125, %v365_v20 }
 0x158   : > { %v362_v14 = vld [vmem:[#allocation5 + $0x38] sm:$0xff]  ;;  %389 = vst [vmem:[#allocation5 + $0x10] sm:$0xff] %v373_v6  ;;  %390 = vst [vmem:[#allocation5 + $0x18] sm:$0xff] %v374_v10  ;;  %v382_v24 = vmul.f32 0.00048828125, %v366_v21  ;;  %v367_v25 = vld [vmem:[#allocation5 + $0x60] sm:$0xff] }
 0x159   : > { %v378_v17 = vmul.f32 0.00048828125, %v362_v14  ;;  %391 = vst [vmem:[#allocation5 + $0x20] sm:$0xff] %v375_v11  ;;  %392 = vst [vmem:[#allocation5 + $0x28] sm:$0xff] %v376_v12  ;;  %v368_v26 = vld [vmem:[#allocation5 + $0x68] sm:$0xff]  ;;  %v383_v28 = vmul.f32 0.00048828125, %v367_v25  ;;  %v370_v31 = vld [vmem:[#allocation5 + $0x78] sm:$0xff] }
 0x15a   : > { %v361_v13 = vld [vmem:[#allocation5 + $0x30] sm:$0xff]  ;;  %395 = vst [vmem:[#allocation5 + $0x40] sm:$0xff] %v379_v18  ;;  %v384_v29 = vmul.f32 0.00048828125, %v368_v26  ;;  %396 = vst [vmem:[#allocation5 + $0x48] sm:$0xff] %v380_v22  ;;  %v386_v32 = vmul.f32 0.00048828125, %v370_v31 }
 0x15b   : > { %v377_v16 = vmul.f32 0.00048828125, %v361_v13  ;;  %v369_v27 = vld [vmem:[#allocation5 + $0x70] sm:$0xff]  ;;  %394 = vst [vmem:[#allocation5 + $0x38] sm:$0xff] %v378_v17  ;;  %397 = vst [vmem:[#allocation5 + $0x50] sm:$0xff] %v381_v23 }
 0x15c   : > { %v385_v30 = vmul.f32 0.00048828125, %v369_v27  ;;  %398 = vst [vmem:[#allocation5 + $0x58] sm:$0xff] %v382_v24  ;;  %399 = vst [vmem:[#allocation5 + $0x60] sm:$0xff] %v383_v28 }
 0x15d   : > { %393 = vst [vmem:[#allocation5 + $0x30] sm:$0xff] %v377_v16  ;;  %400 = vst [vmem:[#allocation5 + $0x68] sm:$0xff] %v384_v29 }
 0x15e   : > { %401 = vst [vmem:[#allocation5 + $0x70] sm:$0xff] %v385_v30  ;;  %402 = vst [vmem:[#allocation5 + $0x78] sm:$0xff] %v386_v32 }
 0x15f PF: > { %p606_p1 = scmp.eq.s32.totalorder %s776_s10, 1  ;;  %s744_s9 = smov [#allocation5]  }
 0x160   : > { %s409_s15 = sshll.u32 %s744_s9, 4  ;;  %s410_s15 = int_to_ptr.vmem [resolvable:$true] %s409_s15 }
 0x161   : > { %s675_s21 = scalar_lea.vmem %s410_s15, 2048  ;;  %p682_p5 = scmp.lt.s32.totalorder %s410_s15, %s410_s15 }
 0x162   : > { %p676_p2 = scmp.ne.s32.totalorder %s410_s15, %s675_s21  ;;  %p683_p6 = scmp.lt.s32.totalorder %s675_s21, %s675_s21 }
 0x164   : > { %p677_p3 = pnand %p676_p2, %p606_p1  ;;  %p684_p9 = por %p683_p6, %p682_p5 }
 0x166   : > { %p678_p4 = pneg %p677_p3 }
 0x168   : > { %p685_p11 = pnand %p684_p9, %p678_p4 }
 0x16a   : > { %688 = shalt.err (!%p685_p11)
}
 0x16b   : > { %s745_s22 = smov 128   ;;  %s746_s23 = smov 8  }
 0x16c   : > { %598 = dma.vmem_to_hbm [thread:$0]  (%p606_p1), %s410_s15, 2048, %s926_s1, [#allocation4], %s745_s22, %s745_s22, %s746_s23  }
 0x16d   : > { %720 = dma.done.wait (%p606_p1), [#allocation4], 2048  }
 0x16e   : > { %722 = vsyncadd (%p606_p1), [#allocation4], 4294965248 }
 0x16f PF: > { %p12_p10 = scmp.ge.s32.totalorder %s779_s11, 4   ;;  %s931_s6 = smov %s729_s7 }
 0x170   : > { %s932_s7 = smov %s733_s8  ;;  %s933_s8 = smov %s789_s14 }
 0x171   : > { %s934_s9 = smov %s779_s11  ;;  %14 = sbr.rel (!%p12_p10) target bundleno = 4 (0x4), region = 69 }
 0x176   :  { %425 = vsyncpa [#allocation3], 1 }
 0x177   :  { %427 = vsyncpa [#allocation3 + $0x1], 1 }
 0x178   :  { %428 = vsyncpa [#allocation4], 1 }
 0x179   :  { %430 = vsyncpa [#allocation4 + $0x1], 1 }

</bundles_post_ra>
